<compile_context>
chip_gen: v7x
topology: tpu7x:2x2x1
jax: 0.10.0
libtpu: 0.0.40
codegen_flags: <defaults>
</compile_context>

<pallas_src>
import functools

import jax
import jax.numpy as jnp
from jax.experimental import pallas as pl
from jax.experimental.pallas import tpu as pltpu

EPS = 1e-5


def _round_up(x, m):
    return (x + m - 1) // m * m


def _cdiv(a, b):
    return -(-a // b)


def _vmem_limit_bytes():
    """Generation-aware scoped-VMEM limit (headroom below physical VMEM)."""
    phys = None
    try:
        info = pltpu.get_tpu_info()
        for name in ("vmem_capacity_bytes", "vmem_size_bytes", "vmem_bytes"):
            v = getattr(info, name, None)
            if v:
                phys = int(v)
                break
    except Exception:
        phys = None
    if not phys:
        phys = 64 * 1024 * 1024  # conservative: v7x physical VMEM
    # ~75% of physical: ~48 MiB on v7x (64 MiB), ~96 MiB on v5e/v6e (128 MiB).
    return int(min(phys * 3 // 4, 112 * 1024 * 1024))


# ---------------------------------------------------------------------------
# Pass 1: conv-as-matmul (MXU) + per-tile partial BN statistics
#   w_ref : (Cout_pad, Kpad)   compute dtype, resident across the grid
#   p_ref : (Kpad, tm)         compute dtype, one M-tile of im2col patches
#   y_ref : (Cout_pad, tm)     compute dtype (bf16 halves the y HBM traffic)
#   s1/s2 : (1, Cout_pad, 1)   f32 per-tile sum(y) / sum(y*y), from the f32
#                              MXU accumulator (before the bf16 cast).
# ---------------------------------------------------------------------------
def _conv_stats_kernel(w_ref, p_ref, y_ref, s1_ref, s2_ref, *, slab):
    y = jnp.dot(w_ref[...], p_ref[...], preferred_element_type=jnp.float32)
    y_ref[...] = y.astype(y_ref.dtype)
    c_out, tm = y.shape
    # Chunked reduction over lane slabs: only one slab of y*y is live at a
    # time, so big tm doesn't spill vregs; VPU mul + XLU reduce hide under the
    # DMA/MXU-bound schedule.
    s1 = jnp.zeros((c_out, 1), jnp.float32)
    s2 = jnp.zeros((c_out, 1), jnp.float32)
    for s0 in range(0, tm, slab):
        ys = y[:, s0:s0 + slab]
        s1 = s1 + jnp.sum(ys, axis=1, keepdims=True)
        s2 = s2 + jnp.sum(ys * ys, axis=1, keepdims=True)
    s1_ref[...] = s1[None]
    s2_ref[...] = s2[None]


def _conv_stats_call(w_t, p_t, tm, y_dtype, vmem_limit):
    c_out, k_pad = w_t.shape
    _, m_pad = p_t.shape
    nt = m_pad // tm
    in_item = jnp.dtype(p_t.dtype).itemsize
    y_item = jnp.dtype(y_dtype).itemsize
    cost = pl.CostEstimate(
        flops=2 * m_pad * k_pad * c_out,
        transcendentals=0,
        bytes_accessed=(m_pad * k_pad + c_out * k_pad) * in_item
        + m_pad * c_out * y_item
        + 2 * nt * c_out * 4,
    )
    kernel = functools.partial(_conv_stats_kernel, slab=min(512, tm))
    return pl.pallas_call(
        kernel,
        out_shape=(
            jax.ShapeDtypeStruct((c_out, m_pad), y_dtype),    # y (pre-BN)
            jax.ShapeDtypeStruct((nt, c_out, 1), jnp.float32),  # partial sum
            jax.ShapeDtypeStruct((nt, c_out, 1), jnp.float32),  # partial sumsq
        ),
        grid=(nt,),
        in_specs=[
            pl.BlockSpec((c_out, k_pad), lambda i: (0, 0)),   # weights (resident)
            pl.BlockSpec((k_pad, tm), lambda i: (0, i)),      # patch tile
        ],
        out_specs=(
            pl.BlockSpec((c_out, tm), lambda i: (0, i)),
            pl.BlockSpec((1, c_out, 1), lambda i: (i, 0, 0)),
            pl.BlockSpec((1, c_out, 1), lambda i: (i, 0, 0)),
        ),
        compiler_params=pltpu.CompilerParams(
            dimension_semantics=("parallel",),
            vmem_limit_bytes=vmem_limit,
        ),
        cost_estimate=cost,
    )(w_t, p_t)


# ---------------------------------------------------------------------------
# Pass 2: apply BatchNorm (precomputed per-channel scale/shift) + ReLU
# ---------------------------------------------------------------------------
def _bn_relu_kernel(y_ref, scale_ref, shift_ref, o_ref):
    y = y_ref[...].astype(jnp.float32)
    o = jnp.maximum(y * scale_ref[...] + shift_ref[...], 0.0)
    o_ref[...] = o.astype(o_ref.dtype)


def _bn_relu_call(y_t, scale, shift, tm, out_dtype, vmem_limit):
    c_out, m_pad = y_t.shape
    nt = m_pad // tm
    y_item = jnp.dtype(y_t.dtype).itemsize
    out_item = jnp.dtype(out_dtype).itemsize
    cost = pl.CostEstimate(
        flops=3 * c_out * m_pad,
        transcendentals=0,
        bytes_accessed=c_out * m_pad * (y_item + out_item) + 2 * c_out * 4,
    )
    return pl.pallas_call(
        _bn_relu_kernel,
        out_shape=jax.ShapeDtypeStruct((c_out, m_pad), out_dtype),
        grid=(nt,),
        in_specs=[
            pl.BlockSpec((c_out, tm), lambda i: (0, i)),
            pl.BlockSpec((c_out, 1), lambda i: (0, 0)),
            pl.BlockSpec((c_out, 1), lambda i: (0, 0)),
        ],
        out_specs=pl.BlockSpec((c_out, tm), lambda i: (0, i)),
        compiler_params=pltpu.CompilerParams(
            dimension_semantics=("parallel",),
            vmem_limit_bytes=vmem_limit,
        ),
        cost_estimate=cost,
    )(y_t, scale, shift)


# ---------------------------------------------------------------------------
# One stage: conv3x3(VALID) -> BN(train stats) -> ReLU, in CNHW layout.
# ---------------------------------------------------------------------------
def _conv_bn_relu(x_cnhw, w_oihw, gamma, beta, *, tm, compute_dtype, out_dtype,
                  vmem_limit):
    c_in, n, h, w = x_cnhw.shape
    c_out = w_oihw.shape[0]
    ho, wo = h - 2, w - 2
    m = n * ho * wo

    in_item = jnp.dtype(compute_dtype).itemsize
    y_item = in_item                       # intermediate y stored in compute dtype
    out_item = jnp.dtype(out_dtype).itemsize
    sub = 32 // in_item                    # sublane granularity: 16 bf16 / 8 f32

    # im2col in compute dtype (cast BEFORE tap extraction: half the glue bytes).
    # TODO(synk): move in-kernel (halo tiles + 9 shifted dots) to eliminate the
    # 9x-duplicated patch matrix in HBM.
    x_c = x_cnhw.astype(compute_dtype)
    taps = [x_c[:, :, dy:dy + ho, dx:dx + wo].reshape(c_in, m)
            for dy in range(3) for dx in range(3)]
    p_t = jnp.concatenate(taps, axis=0)                    # (9*Cin, M), tap-major

    k = 9 * c_in
    k_pad = _round_up(k, sub)
    c_out_pad = _round_up(c_out, sub)

    # Tile selection from the real double-buffered VMEM footprint.
    budget = int(vmem_limit * 0.7)
    w_bytes = c_out_pad * k_pad * in_item
    per_lane1 = 2 * (k_pad * in_item + c_out_pad * y_item)   # dbl-buffered in+out
    tm_cap = max(128, (max(budget - w_bytes, 0) // per_lane1) // 128 * 128)
    tm1 = min(_round_up(tm, 128), tm_cap, _round_up(m, 128))
    nt = _cdiv(m, tm1)
    tm1 = _round_up(_cdiv(m, nt), 128)     # rebalance: padding waste < one tile
    m_pad = nt * tm1

    p_t = jnp.pad(p_t, ((0, k_pad - k), (0, m_pad - m)))

    # PyTorch weight (Cout, Cin, 3, 3) -> (Cout_pad, Kpad), same tap ordering.
    w_t = jnp.transpose(w_oihw, (0, 2, 3, 1)).reshape(c_out, k).astype(compute_dtype)
    w_t = jnp.pad(w_t, ((0, c_out_pad - c_out), (0, k_pad - k)))

    # Pass 1 (Pallas): conv matmul + per-tile partial BN sums.
    y_t, s1p, s2p = _conv_stats_call(w_t, p_t, tm1, compute_dtype, vmem_limit)

    # Finalize BN stats (tiny (Cout,)-sized math; zero-padded rows/cols add 0).
    s1 = jnp.sum(s1p, axis=0)[:, 0]
    s2 = jnp.sum(s2p, axis=0)[:, 0]
    mean = s1 / m
    var = jnp.maximum(s2 / m - mean * mean, 0.0)             # biased (training) var
    g_pad = jnp.pad(gamma, (0, c_out_pad - c_out), constant_values=1.0)
    b_pad = jnp.pad(beta, (0, c_out_pad - c_out))
    scale = g_pad * jax.lax.rsqrt(var + EPS)
    shift = b_pad - mean * scale

    # Pass 2 (Pallas): normalize + affine + ReLU.  Smaller footprint -> may use
    # a larger tile (multiple of tm1 that divides m_pad).
    per_lane2 = 2 * c_out_pad * (y_item + out_item)
    tm2_cap = max(tm1, (budget // per_lane2) // 128 * 128)
    d_best = max(d for d in range(1, nt + 1) if nt % d == 0 and tm1 * d <= tm2_cap)
    tm2 = tm1 * d_best
    # TODO(synk): fuse this pass into building the next stage's input once the
    # im2col moves in-kernel (saves one full read+write of y per stage).
    out_t = _bn_relu_call(y_t, scale[:, None], shift[:, None], tm2, out_dtype,
                          vmem_limit)
    return out_t[:c_out, :m].reshape(c_out, n, ho, wo)


@functools.partial(jax.jit, static_argnames=("tm", "compute_dtype"))
def conv_bn_forward(x_nchw, params, *, tm=1024, compute_dtype=jnp.bfloat16):
    # tm=1024 default (sweep 1024-2048 at realistic sizes); the per-stage code
    # clamps it to the generation-aware VMEM budget and to the problem size.
    vmem_limit = _vmem_limit_bytes()
    x = jnp.transpose(x_nchw, (1, 0, 2, 3))                  # NCHW -> CNHW
    h = _conv_bn_relu(x, params["w1"], params["g1"], params["b1"],
                      tm=tm, compute_dtype=compute_dtype,
                      out_dtype=compute_dtype, vmem_limit=vmem_limit)
    y = _conv_bn_relu(h, params["w2"], params["g2"], params["b2"],
                      tm=tm, compute_dtype=compute_dtype,
                      out_dtype=jnp.float32, vmem_limit=vmem_limit)
    return jnp.transpose(y, (1, 0, 2, 3))                    # CNHW -> NCHW


# ---------------------------------------------------------------------------
# Pure-JAX reference (correctness check only)
# ---------------------------------------------------------------------------
def _reference(x, params):
    def conv(x, w):
        return jax.lax.conv_general_dilated(
            x, w, window_strides=(1, 1), padding="VALID",
            dimension_numbers=("NCHW", "OIHW", "NCHW"))

    def bn_relu(h, g, b):
        mean = jnp.mean(h, axis=(0, 2, 3), keepdims=True)
        var = jnp.mean(jnp.square(h - mean), axis=(0, 2, 3), keepdims=True)
        y = (h - mean) * jax.lax.rsqrt(var + EPS)
        y = y * g[None, :, None, None] + b[None, :, None, None]
        return jnp.maximum(y, 0.0)

    h = bn_relu(conv(x, params["w1"]), params["g1"], params["b1"])
    return bn_relu(conv(h, params["w2"]), params["g2"], params["b2"])


def _init_params(key, in_ch, out_ch, hidden):
    k1, k2 = jax.random.split(key)
    std1 = (2.0 / (in_ch * 9)) ** 0.5
    std2 = (2.0 / (hidden * 9)) ** 0.5
    return {
        "w1": jax.random.normal(k1, (hidden, in_ch, 3, 3), jnp.float32) * std1,
        "g1": jnp.ones((hidden,), jnp.float32),   # BatchNorm2d init: weight=1
        "b1": jnp.zeros((hidden,), jnp.float32),  # BatchNorm2d init: bias=0
        "w2": jax.random.normal(k2, (out_ch, hidden, 3, 3), jnp.float32) * std2,
        "g2": jnp.ones((out_ch,), jnp.float32),
        "b2": jnp.zeros((out_ch,), jnp.float32),
    }


if __name__ == "__main__":
    key = jax.random.PRNGKey(0)
    kx, kp = jax.random.split(key)

    in_ch, out_ch = 4, 8                 # hidden_dim defaults to out_channel
    N, H, W = 2, 16, 16
    x = jax.random.normal(kx, (N, in_ch, H, W), jnp.float32)
    params = _init_params(kp, in_ch, out_ch, out_ch)

    ref = _reference(x, params)

    # f32 MXU operands: tight-ish semantic check against the XLA reference.
    out_f32 = jax.block_until_ready(
        conv_bn_forward(x, params, compute_dtype=jnp.float32))
    assert out_f32.shape == (N, out_ch, H - 4, W - 4), out_f32.shape
    assert jnp.allclose(out_f32, ref, atol=5e-3, rtol=5e-3), \
        float(jnp.max(jnp.abs(out_f32 - ref)))

    # bf16 memory/compute path (default / throughput config): loose sanity check.
    out_bf16 = jax.block_until_ready(conv_bn_forward(x, params))
    assert out_bf16.shape == (N, out_ch, H - 4, W - 4), out_bf16.shape
    assert jnp.allclose(out_bf16, ref, atol=2e-1, rtol=5e-2), \
        float(jnp.max(jnp.abs(out_bf16 - ref)))

    print("KERNEL_OK")
</pallas_src>

<mosaic_0001>
module attributes {stable_mosaic.version = 11 : i64} {
  func.func @_conv_stats_kernel(%arg0: i32, %arg1: memref<8x40xf32, #tpu.memory_space<vmem>>, %arg2: memref<40x512xf32, #tpu.memory_space<vmem>>, %arg3: memref<8x512xf32, #tpu.memory_space<vmem>>, %arg4: memref<1x8x1xf32, #tpu.memory_space<vmem>>, %arg5: memref<1x8x1xf32, #tpu.memory_space<vmem>>) attributes {dimension_semantics = [#tpu.dimension_semantics<parallel>], iteration_bounds = array<i64: 1>, scalar_prefetch = 0 : i64, scratch_operands = 0 : i64, tpu.core_type = #tpu.core_type<tc>, window_params = [{pipeline_mode = #tpu.pipeline_mode<synchronous>, transform_indices = @transform_0, window_bounds = array<i64: 8, 40>}, {transform_indices = @transform_1, window_bounds = array<i64: 40, 512>}, {transform_indices = @transform_2, window_bounds = array<i64: 8, 512>}, {transform_indices = @transform_3, window_bounds = array<i64: 1, 8, 1>}, {transform_indices = @transform_4, window_bounds = array<i64: 1, 8, 1>}]} {
    %c0 = arith.constant 0 : index
    %c0_0 = arith.constant 0 : index
    %0 = vector.load %arg1[%c0, %c0_0] : memref<8x40xf32, #tpu.memory_space<vmem>>, vector<8x40xf32>
    %c0_1 = arith.constant 0 : index
    %c0_2 = arith.constant 0 : index
    %1 = vector.load %arg2[%c0_1, %c0_2] : memref<40x512xf32, #tpu.memory_space<vmem>>, vector<40x512xf32>
    %cst = arith.constant dense<0.000000e+00> : vector<8x512xf32>
    %2 = tpu.matmul %0, %1, %cst {dimension_numbers = #tpu.dot_dimension_numbers<[1], [0], [0], [1], [0, 0, 1, 1], [], []>} : vector<8x40xf32>, vector<40x512xf32>, vector<8x512xf32> -> vector<8x512xf32>
    %c0_3 = arith.constant 0 : index
    %c0_4 = arith.constant 0 : index
    %3 = vector.load %arg3[%c0_3, %c0_4] : memref<8x512xf32, #tpu.memory_space<vmem>>, vector<8x512xf32>
    tpu.vector_store %arg3[%c0_3, %c0_4], %2 {strides = array<i32>} : memref<8x512xf32, #tpu.memory_space<vmem>>, vector<8x512xf32>,
    %cst_5 = arith.constant 0.000000e+00 : f32
    %4 = vector.broadcast %cst_5 : f32 to vector<8x1xf32>
    %cst_6 = arith.constant 0.000000e+00 : f32
    %5 = vector.broadcast %cst_6 : f32 to vector<8x1xf32>
    %cst_7 = arith.constant dense<0.000000e+00> : vector<8xf32>
    %6 = vector.multi_reduction <add>, %2, %cst_7 [1] : vector<8x512xf32> to vector<8xf32>
    %7 = vector.shape_cast %6 : vector<8xf32> to vector<8x1xf32>
    %8 = arith.addf %4, %7 : vector<8x1xf32>
    %9 = arith.mulf %2, %2 : vector<8x512xf32>
    %cst_8 = arith.constant dense<0.000000e+00> : vector<8xf32>
    %10 = vector.multi_reduction <add>, %9, %cst_8 [1] : vector<8x512xf32> to vector<8xf32>
    %11 = vector.shape_cast %10 : vector<8xf32> to vector<8x1xf32>
    %12 = arith.addf %5, %11 : vector<8x1xf32>
    %13 = vector.shape_cast %8 : vector<8x1xf32> to vector<1x8x1xf32>
    %c0_9 = arith.constant 0 : index
    %c0_10 = arith.constant 0 : index
    %c0_11 = arith.constant 0 : index
    %14 = vector.load %arg4[%c0_9, %c0_10, %c0_11] : memref<1x8x1xf32, #tpu.memory_space<vmem>>, vector<1x8x1xf32>
    tpu.vector_store %arg4[%c0_9, %c0_10, %c0_11], %13 {strides = array<i32>} : memref<1x8x1xf32, #tpu.memory_space<vmem>>, vector<1x8x1xf32>,
    %15 = vector.shape_cast %12 : vector<8x1xf32> to vector<1x8x1xf32>
    %c0_12 = arith.constant 0 : index
    %c0_13 = arith.constant 0 : index
    %c0_14 = arith.constant 0 : index
    %16 = vector.load %arg5[%c0_12, %c0_13, %c0_14] : memref<1x8x1xf32, #tpu.memory_space<vmem>>, vector<1x8x1xf32>
    tpu.vector_store %arg5[%c0_12, %c0_13, %c0_14], %15 {strides = array<i32>} : memref<1x8x1xf32, #tpu.memory_space<vmem>>, vector<1x8x1xf32>,
    return
  }
  func.func @transform_0(%arg0: i32) -> (i32, i32) {
    %c0_i32 = arith.constant 0 : i32
    %c0_i32_0 = arith.constant 0 : i32
    %c0_i32_1 = arith.constant 0 : i32
    return %c0_i32, %c0_i32_0 : i32, i32
  }
  func.func @transform_1(%arg0: i32) -> (i32, i32) {
    %c0_i32 = arith.constant 0 : i32
    %c0_i32_0 = arith.constant 0 : i32
    return %c0_i32, %arg0 : i32, i32
  }
  func.func @transform_2(%arg0: i32) -> (i32, i32) {
    %c0_i32 = arith.constant 0 : i32
    %c0_i32_0 = arith.constant 0 : i32
    return %c0_i32, %arg0 : i32, i32
  }
  func.func @transform_3(%arg0: i32) -> (i32, i32, i32) {
    %c0_i32 = arith.constant 0 : i32
    %c0_i32_0 = arith.constant 0 : i32
    %c0_i32_1 = arith.constant 0 : i32
    return %arg0, %c0_i32, %c0_i32_0 : i32, i32, i32
  }
  func.func @transform_4(%arg0: i32) -> (i32, i32, i32) {
    %c0_i32 = arith.constant 0 : i32
    %c0_i32_0 = arith.constant 0 : i32
    %c0_i32_1 = arith.constant 0 : i32
    return %arg0, %c0_i32, %c0_i32_0 : i32, i32, i32
  }
}

module attributes {stable_mosaic.version = 11 : i64} {
  func.func @_bn_relu_kernel(%arg0: i32, %arg1: memref<8x512xf32, #tpu.memory_space<vmem>>, %arg2: memref<8x1xf32, #tpu.memory_space<vmem>>, %arg3: memref<8x1xf32, #tpu.memory_space<vmem>>, %arg4: memref<8x512xf32, #tpu.memory_space<vmem>>) attributes {dimension_semantics = [#tpu.dimension_semantics<parallel>], iteration_bounds = array<i64: 1>, scalar_prefetch = 0 : i64, scratch_operands = 0 : i64, tpu.core_type = #tpu.core_type<tc>, window_params = [{transform_indices = @transform_0, window_bounds = array<i64: 8, 512>}, {pipeline_mode = #tpu.pipeline_mode<synchronous>, transform_indices = @transform_1, window_bounds = array<i64: 8, 1>}, {pipeline_mode = #tpu.pipeline_mode<synchronous>, transform_indices = @transform_2, window_bounds = array<i64: 8, 1>}, {transform_indices = @transform_3, window_bounds = array<i64: 8, 512>}]} {
    %c0 = arith.constant 0 : index
    %c0_0 = arith.constant 0 : index
    %0 = vector.load %arg1[%c0, %c0_0] : memref<8x512xf32, #tpu.memory_space<vmem>>, vector<8x512xf32>
    %c0_1 = arith.constant 0 : index
    %c0_2 = arith.constant 0 : index
    %1 = vector.load %arg2[%c0_1, %c0_2] : memref<8x1xf32, #tpu.memory_space<vmem>>, vector<8x1xf32>
    %2 = vector.broadcast %1 : vector<8x1xf32> to vector<8x512xf32>
    %3 = arith.mulf %0, %2 : vector<8x512xf32>
    %c0_3 = arith.constant 0 : index
    %c0_4 = arith.constant 0 : index
    %4 = vector.load %arg3[%c0_3, %c0_4] : memref<8x1xf32, #tpu.memory_space<vmem>>, vector<8x1xf32>
    %5 = vector.broadcast %4 : vector<8x1xf32> to vector<8x512xf32>
    %6 = arith.addf %3, %5 : vector<8x512xf32>
    %cst = arith.constant 0.000000e+00 : f32
    %7 = vector.broadcast %cst : f32 to vector<8x512xf32>
    %8 = arith.maximumf %6, %7 : vector<8x512xf32>
    %c0_5 = arith.constant 0 : index
    %c0_6 = arith.constant 0 : index
    %9 = vector.load %arg4[%c0_5, %c0_6] : memref<8x512xf32, #tpu.memory_space<vmem>>, vector<8x512xf32>
    tpu.vector_store %arg4[%c0_5, %c0_6], %8 {strides = array<i32>} : memref<8x512xf32, #tpu.memory_space<vmem>>, vector<8x512xf32>,
    return
  }
  func.func @transform_0(%arg0: i32) -> (i32, i32) {
    %c0_i32 = arith.constant 0 : i32
    %c0_i32_0 = arith.constant 0 : i32
    return %c0_i32, %arg0 : i32, i32
  }
  func.func @transform_1(%arg0: i32) -> (i32, i32) {
    %c0_i32 = arith.constant 0 : i32
    %c0_i32_0 = arith.constant 0 : i32
    %c0_i32_1 = arith.constant 0 : i32
    return %c0_i32, %c0_i32_0 : i32, i32
  }
  func.func @transform_2(%arg0: i32) -> (i32, i32) {
    %c0_i32 = arith.constant 0 : i32
    %c0_i32_0 = arith.constant 0 : i32
    %c0_i32_1 = arith.constant 0 : i32
    return %c0_i32, %c0_i32_0 : i32, i32
  }
  func.func @transform_3(%arg0: i32) -> (i32, i32) {
    %c0_i32 = arith.constant 0 : i32
    %c0_i32_0 = arith.constant 0 : i32
    return %c0_i32, %arg0 : i32, i32
  }
}

module attributes {stable_mosaic.version = 11 : i64} {
  func.func @_conv_stats_kernel(%arg0: i32, %arg1: memref<8x72xf32, #tpu.memory_space<vmem>>, %arg2: memref<72x384xf32, #tpu.memory_space<vmem>>, %arg3: memref<8x384xf32, #tpu.memory_space<vmem>>, %arg4: memref<1x8x1xf32, #tpu.memory_space<vmem>>, %arg5: memref<1x8x1xf32, #tpu.memory_space<vmem>>) attributes {dimension_semantics = [#tpu.dimension_semantics<parallel>], iteration_bounds = array<i64: 1>, scalar_prefetch = 0 : i64, scratch_operands = 0 : i64, tpu.core_type = #tpu.core_type<tc>, window_params = [{pipeline_mode = #tpu.pipeline_mode<synchronous>, transform_indices = @transform_0, window_bounds = array<i64: 8, 72>}, {transform_indices = @transform_1, window_bounds = array<i64: 72, 384>}, {transform_indices = @transform_2, window_bounds = array<i64: 8, 384>}, {transform_indices = @transform_3, window_bounds = array<i64: 1, 8, 1>}, {transform_indices = @transform_4, window_bounds = array<i64: 1, 8, 1>}]} {
    %c0 = arith.constant 0 : index
    %c0_0 = arith.constant 0 : index
    %0 = vector.load %arg1[%c0, %c0_0] : memref<8x72xf32, #tpu.memory_space<vmem>>, vector<8x72xf32>
    %c0_1 = arith.constant 0 : index
    %c0_2 = arith.constant 0 : index
    %1 = vector.load %arg2[%c0_1, %c0_2] : memref<72x384xf32, #tpu.memory_space<vmem>>, vector<72x384xf32>
    %cst = arith.constant dense<0.000000e+00> : vector<8x384xf32>
    %2 = tpu.matmul %0, %1, %cst {dimension_numbers = #tpu.dot_dimension_numbers<[1], [0], [0], [1], [0, 0, 1, 1], [], []>} : vector<8x72xf32>, vector<72x384xf32>, vector<8x384xf32> -> vector<8x384xf32>
    %c0_3 = arith.constant 0 : index
    %c0_4 = arith.constant 0 : index
    %3 = vector.load %arg3[%c0_3, %c0_4] : memref<8x384xf32, #tpu.memory_space<vmem>>, vector<8x384xf32>
    tpu.vector_store %arg3[%c0_3, %c0_4], %2 {strides = array<i32>} : memref<8x384xf32, #tpu.memory_space<vmem>>, vector<8x384xf32>,
    %cst_5 = arith.constant 0.000000e+00 : f32
    %4 = vector.broadcast %cst_5 : f32 to vector<8x1xf32>
    %cst_6 = arith.constant 0.000000e+00 : f32
    %5 = vector.broadcast %cst_6 : f32 to vector<8x1xf32>
    %cst_7 = arith.constant dense<0.000000e+00> : vector<8xf32>
    %6 = vector.multi_reduction <add>, %2, %cst_7 [1] : vector<8x384xf32> to vector<8xf32>
    %7 = vector.shape_cast %6 : vector<8xf32> to vector<8x1xf32>
    %8 = arith.addf %4, %7 : vector<8x1xf32>
    %9 = arith.mulf %2, %2 : vector<8x384xf32>
    %cst_8 = arith.constant dense<0.000000e+00> : vector<8xf32>
    %10 = vector.multi_reduction <add>, %9, %cst_8 [1] : vector<8x384xf32> to vector<8xf32>
    %11 = vector.shape_cast %10 : vector<8xf32> to vector<8x1xf32>
    %12 = arith.addf %5, %11 : vector<8x1xf32>
    %13 = vector.shape_cast %8 : vector<8x1xf32> to vector<1x8x1xf32>
    %c0_9 = arith.constant 0 : index
    %c0_10 = arith.constant 0 : index
    %c0_11 = arith.constant 0 : index
    %14 = vector.load %arg4[%c0_9, %c0_10, %c0_11] : memref<1x8x1xf32, #tpu.memory_space<vmem>>, vector<1x8x1xf32>
    tpu.vector_store %arg4[%c0_9, %c0_10, %c0_11], %13 {strides = array<i32>} : memref<1x8x1xf32, #tpu.memory_space<vmem>>, vector<1x8x1xf32>,
    %15 = vector.shape_cast %12 : vector<8x1xf32> to vector<1x8x1xf32>
    %c0_12 = arith.constant 0 : index
    %c0_13 = arith.constant 0 : index
    %c0_14 = arith.constant 0 : index
    %16 = vector.load %arg5[%c0_12, %c0_13, %c0_14] : memref<1x8x1xf32, #tpu.memory_space<vmem>>, vector<1x8x1xf32>
    tpu.vector_store %arg5[%c0_12, %c0_13, %c0_14], %15 {strides = array<i32>} : memref<1x8x1xf32, #tpu.memory_space<vmem>>, vector<1x8x1xf32>,
    return
  }
  func.func @transform_0(%arg0: i32) -> (i32, i32) {
    %c0_i32 = arith.constant 0 : i32
    %c0_i32_0 = arith.constant 0 : i32
    %c0_i32_1 = arith.constant 0 : i32
    return %c0_i32, %c0_i32_0 : i32, i32
  }
  func.func @transform_1(%arg0: i32) -> (i32, i32) {
    %c0_i32 = arith.constant 0 : i32
    %c0_i32_0 = arith.constant 0 : i32
    return %c0_i32, %arg0 : i32, i32
  }
  func.func @transform_2(%arg0: i32) -> (i32, i32) {
    %c0_i32 = arith.constant 0 : i32
    %c0_i32_0 = arith.constant 0 : i32
    return %c0_i32, %arg0 : i32, i32
  }
  func.func @transform_3(%arg0: i32) -> (i32, i32, i32) {
    %c0_i32 = arith.constant 0 : i32
    %c0_i32_0 = arith.constant 0 : i32
    %c0_i32_1 = arith.constant 0 : i32
    return %arg0, %c0_i32, %c0_i32_0 : i32, i32, i32
  }
  func.func @transform_4(%arg0: i32) -> (i32, i32, i32) {
    %c0_i32 = arith.constant 0 : i32
    %c0_i32_0 = arith.constant 0 : i32
    %c0_i32_1 = arith.constant 0 : i32
    return %arg0, %c0_i32, %c0_i32_0 : i32, i32, i32
  }
}

module attributes {stable_mosaic.version = 11 : i64} {
  func.func @_bn_relu_kernel(%arg0: i32, %arg1: memref<8x384xf32, #tpu.memory_space<vmem>>, %arg2: memref<8x1xf32, #tpu.memory_space<vmem>>, %arg3: memref<8x1xf32, #tpu.memory_space<vmem>>, %arg4: memref<8x384xf32, #tpu.memory_space<vmem>>) attributes {dimension_semantics = [#tpu.dimension_semantics<parallel>], iteration_bounds = array<i64: 1>, scalar_prefetch = 0 : i64, scratch_operands = 0 : i64, tpu.core_type = #tpu.core_type<tc>, window_params = [{transform_indices = @transform_0, window_bounds = array<i64: 8, 384>}, {pipeline_mode = #tpu.pipeline_mode<synchronous>, transform_indices = @transform_1, window_bounds = array<i64: 8, 1>}, {pipeline_mode = #tpu.pipeline_mode<synchronous>, transform_indices = @transform_2, window_bounds = array<i64: 8, 1>}, {transform_indices = @transform_3, window_bounds = array<i64: 8, 384>}]} {
    %c0 = arith.constant 0 : index
    %c0_0 = arith.constant 0 : index
    %0 = vector.load %arg1[%c0, %c0_0] : memref<8x384xf32, #tpu.memory_space<vmem>>, vector<8x384xf32>
    %c0_1 = arith.constant 0 : index
    %c0_2 = arith.constant 0 : index
    %1 = vector.load %arg2[%c0_1, %c0_2] : memref<8x1xf32, #tpu.memory_space<vmem>>, vector<8x1xf32>
    %2 = vector.broadcast %1 : vector<8x1xf32> to vector<8x384xf32>
    %3 = arith.mulf %0, %2 : vector<8x384xf32>
    %c0_3 = arith.constant 0 : index
    %c0_4 = arith.constant 0 : index
    %4 = vector.load %arg3[%c0_3, %c0_4] : memref<8x1xf32, #tpu.memory_space<vmem>>, vector<8x1xf32>
    %5 = vector.broadcast %4 : vector<8x1xf32> to vector<8x384xf32>
    %6 = arith.addf %3, %5 : vector<8x384xf32>
    %cst = arith.constant 0.000000e+00 : f32
    %7 = vector.broadcast %cst : f32 to vector<8x384xf32>
    %8 = arith.maximumf %6, %7 : vector<8x384xf32>
    %c0_5 = arith.constant 0 : index
    %c0_6 = arith.constant 0 : index
    %9 = vector.load %arg4[%c0_5, %c0_6] : memref<8x384xf32, #tpu.memory_space<vmem>>, vector<8x384xf32>
    tpu.vector_store %arg4[%c0_5, %c0_6], %8 {strides = array<i32>} : memref<8x384xf32, #tpu.memory_space<vmem>>, vector<8x384xf32>,
    return
  }
  func.func @transform_0(%arg0: i32) -> (i32, i32) {
    %c0_i32 = arith.constant 0 : i32
    %c0_i32_0 = arith.constant 0 : i32
    return %c0_i32, %arg0 : i32, i32
  }
  func.func @transform_1(%arg0: i32) -> (i32, i32) {
    %c0_i32 = arith.constant 0 : i32
    %c0_i32_0 = arith.constant 0 : i32
    %c0_i32_1 = arith.constant 0 : i32
    return %c0_i32, %c0_i32_0 : i32, i32
  }
  func.func @transform_2(%arg0: i32) -> (i32, i32) {
    %c0_i32 = arith.constant 0 : i32
    %c0_i32_0 = arith.constant 0 : i32
    %c0_i32_1 = arith.constant 0 : i32
    return %c0_i32, %c0_i32_0 : i32, i32
  }
  func.func @transform_3(%arg0: i32) -> (i32, i32) {
    %c0_i32 = arith.constant 0 : i32
    %c0_i32_0 = arith.constant 0 : i32
    return %c0_i32, %arg0 : i32, i32
  }
}

</mosaic_0001>

<bundles_post_ra>
// kernel: conv_bn_forward.5
= control target key start
LH: loop header
LB: loop body
LE: loop exit
PB: predicated region body
PF: predicated region fallthrough
CT: control target
= control target key end

     0   :  { %v52_v0 = vmov 0   ;;  %s103_s1 = inlined_call_operand.vmem [shape: f32[8,1], index: 1, kind: input, shape index: {}]   ;;  %s104_s2 = inlined_call_operand.vmem [shape: f32[8,1], index: 2, kind: input, shape index: {}]   ;;  %s105_s0 = inlined_call_operand.vmem [shape: f32[8,512], index: 0, kind: input, shape index: {}]   ;;  %s106_s3 = inlined_call_operand.vmem [shape: f32[8,512], index: 3, kind: output, shape index: {}]  }
   0x1   :  { %51 = vset.pattern.permute.xlu0 %v52_v0  ;;  %v18_v1 = vld [vmem:[%s103_s1] sm:$0xff]  ;;  %v15_v5 = vld [vmem:[%s105_s0 + $0x8] sm:$0xff]  ;;  %v16_v6 = vld [vmem:[%s105_s0 + $0x10] sm:$0xff] }
   0x2   :  { %21 = vperm.xlu0 %51, %v18_v1   ;;  %v28_v2 = vld [vmem:[%s104_s2] sm:$0xff]  ;;  %v17_v7 = vld [vmem:[%s105_s0 + $0x18] sm:$0xff] }
   0x3   :  { %v14_v3 = vld [vmem:[%s105_s0] sm:$0xff] }
   0x6   :  { %31 = vperm.xlu0 %51, %v28_v2  }
  0x81   :  { %v22_v4 = vpop.permute.xlu0 %21 }
  0x82   :  { %v24_v8 = vmul.f32 %v22_v4, %v14_v3  ;;  %v25_v9 = vmul.f32 %v22_v4, %v15_v5  ;;  %v26_v10 = vmul.f32 %v22_v4, %v16_v6  ;;  %v27_v11 = vmul.f32 %v22_v4, %v17_v7 }
  0x85   :  { %v32_v12 = vpop.permute.xlu0 %31 }
  0x86   :  { %v34_v13 = vadd.f32 %v32_v12, %v24_v8  ;;  %v35_v14 = vadd.f32 %v32_v12, %v25_v9  ;;  %v36_v15 = vadd.f32 %v32_v12, %v26_v10  ;;  %v37_v16 = vadd.f32 %v32_v12, %v27_v11 }
  0x88   :  { %v38_v17 = vmax.f32 %v34_v13, 0.0  ;;  %v39_v18 = vmax.f32 %v35_v14, 0.0  ;;  %v40_v19 = vmax.f32 %v36_v15, 0.0  ;;  %v41_v20 = vmax.f32 %v37_v16, 0.0 }
  0x8a   :  { %42 = vst [vmem:[%s106_s3] sm:$0xff] %v38_v17  ;;  %43 = vst [vmem:[%s106_s3 + $0x8] sm:$0xff] %v39_v18 }
  0x8b   :  { %44 = vst [vmem:[%s106_s3 + $0x10] sm:$0xff] %v40_v19  ;;  %45 = vst [vmem:[%s106_s3 + $0x18] sm:$0xff] %v41_v20 }

// kernel: conv_bn_forward.4
= control target key start
LH: loop header
LB: loop body
LE: loop exit
PB: predicated region body
PF: predicated region fallthrough
CT: control target
= control target key end

     0   :  { %v235_v3 = vmov 0.0   ;;  %vm35_vm0 = vcmask 326656   ;;  %vm201_vm1 = vcmask 7168   ;;  %s342_s1 = inlined_call_operand.vmem [shape: f32[40,512], index: 1, kind: input, shape index: {}]   ;;  %s343_s0 = inlined_call_operand.vmem [shape: f32[8,40], index: 0, kind: input, shape index: {}]   ;;  %s344_s2 = inlined_call_operand.vmem [shape: f32[8,512], index: 2, kind: output, shape index: {0}]   ;;  %s345_s3 = inlined_call_operand.vmem [shape: f32[1,8,1], index: 3, kind: output, shape index: {1}]   ;;  %s346_s4 = inlined_call_operand.vmem [shape: f32[1,8,1], index: 4, kind: output, shape index: {2}]  }
   0x1   :  { %v16_v0 = vld [vmem:[%s342_s1 + $0x8] sm:$0xff]  ;;  %v15_v2 = vld [vmem:[%s342_s1] sm:$0xff]  ;;  %103 = vmatprep.mubr.f32.mxu0 %v235_v3  ;;  %174 = vmatprep.mubr.f32.mxu1 %v235_v3  ;;  %v18_v6 = vld [vmem:[%s342_s1 + $0x18] sm:$0xff] }
   0x2   :  { %v20_v1 = vld [vmem:[%s342_s1 + $0x28] sm:$0xff]  ;;  %v19_v5 = vld [vmem:[%s342_s1 + $0x20] sm:$0xff]  ;;  %v22_v7 = vld [vmem:[%s342_s1 + $0x38] sm:$0xff] }
   0x3   :  { %v218_v4 = vpack.c.bf16 %v20_v1, %v16_v0  ;;  %v220_v8 = vpack.c.bf16 %v19_v5, %v15_v2  ;;  %v226_v9 = vpack.c.bf16 %v22_v7, %v18_v6  ;;  %v17_v10 = vld [vmem:[%s342_s1 + $0x10] sm:$0xff]  ;;  %v24_v12 = vld [vmem:[%s342_s1 + $0x48] sm:$0xff]  ;;  %v23_v15 = vld [vmem:[%s342_s1 + $0x40] sm:$0xff] }
   0x4   :  { %v21_v11 = vld [vmem:[%s342_s1 + $0x30] sm:$0xff]  ;;  %v28_v14 = vld [vmem:[%s342_s1 + $0x68] sm:$0xff]  ;;  %v27_v16 = vld [vmem:[%s342_s1 + $0x60] sm:$0xff] }
   0x5   :  { %219 = vmatprep.subr.bf16.mxu0 %v218_v4  ;;  %v228_v13 = vpack.c.bf16 %v21_v11, %v17_v10  ;;  %227 = vmatprep.subr.bf16.mxu1 %v226_v9  ;;  %v222_v17 = vpack.c.bf16 %v28_v14, %v24_v12  ;;  %v224_v18 = vpack.c.bf16 %v27_v16, %v23_v15  ;;  %v26_v19 = vld [vmem:[%s342_s1 + $0x58] sm:$0xff]  ;;  %v25_v21 = vld [vmem:[%s342_s1 + $0x50] sm:$0xff]  ;;  %v32_v25 = vld [vmem:[%s342_s1 + $0x88] sm:$0xff] }
   0x6   :  { %221 = vmatpush1.bf16.msra.mxu0 %v220_v8  ;;  %v30_v20 = vld [vmem:[%s342_s1 + $0x78] sm:$0xff]  ;;  %v29_v23 = vld [vmem:[%s342_s1 + $0x70] sm:$0xff]  ;;  %v31_v27 = vld [vmem:[%s342_s1 + $0x80] sm:$0xff] }
   0x7   :  { %229 = vmatpush1.bf16.msra.mxu1 %v228_v13  ;;  %v230_v22 = vpack.c.bf16 %v30_v20, %v26_v19  ;;  %223 = vmatprep.subr.bf16.mxu0 %v222_v17  ;;  %v232_v24 = vpack.c.bf16 %v29_v23, %v25_v21  ;;  %v34_v26 = vld [vmem:[%s342_s1 + $0x98] sm:$0xff]  ;;  %v14_v28 = vld [vmem:[%s343_s0] sm:$0xff]  ;;  %v33_v29 = vld [vmem:[%s342_s1 + $0x90] sm:$0xff] }
   0x9   :  { %231 = vmatprep.subr.bf16.mxu1 %v230_v22 }
   0xa   :  { %225 = vmatpush1.bf16.msra.mxu0 %v224_v18 }
   0xb   :  { %233 = vmatpush1.bf16.msra.mxu1 %v232_v24  ;;  %47 = vmatprep.subr.mxu0 %v32_v25 }
   0xc   :  { %118 = vmatprep.subr.mxu1 %v34_v26 }
   0xe   :  { %48 = vmatpush1.msra.mxu0 %v31_v27 }
   0xf   :  { %216 = vmatmul.mubr.msk.f32.vlgmr.msra.gmra.mrb[0].mxu0 %vm35_vm0, %v14_v28  ;;  %119 = vmatpush1.msra.mxu1 %v33_v29 }
  0x10   :  { %217 = vmatmul.mubr.msk.f32.vlgmr.msra.gmra.mrb[0].mxu1 %vm35_vm0, %v14_v28 }
  0xe2   :  { %v105_v30 = vpop.f32.mrb[0].mxu0 }
  0xe3   :  { %181 = vst [vmem:[%s344_s2] sm:$0xff] %v105_v30  ;;  %v191_v31 = vmul.f32 %v105_v30, %v105_v30  ;;  %v107_v32 = vpop.f32.mrb[1].mxu0  ;;  %v176_v33 = vpop.f32.mrb[0].mxu1 }
  0xe4   :  { %182 = vst [vmem:[%s344_s2 + $0x8] sm:$0xff] %v107_v32  ;;  %v185_v34 = vadd.f32 %v107_v32, %v105_v30  ;;  %v192_v35 = vmul.f32 %v107_v32, %v107_v32  ;;  %183 = vst [vmem:[%s344_s2 + $0x10] sm:$0xff] %v176_v33  ;;  %v193_v36 = vmul.f32 %v176_v33, %v176_v33  ;;  %v178_v37 = vpop.f32.mrb[1].mxu1 }
  0xe5   :  { %184 = vst [vmem:[%s344_s2 + $0x18] sm:$0xff] %v178_v37  ;;  %v194_v40 = vmul.f32 %v178_v37, %v178_v37 }
  0xe6   :  { %v195_v38 = vadd.f32 %v192_v35, %v191_v31  ;;  %v186_v39 = vadd.f32 %v185_v34, %v176_v33 }
  0xe8   :  { %v187_v41 = vadd.f32 %v186_v39, %v178_v37  ;;  %v196_v42 = vadd.f32 %v195_v38, %v193_v36 }
  0xea   :  { %188 = vadd.xlane.f32.xlu0 %v187_v41  ;;  %v197_v43 = vadd.f32 %v196_v42, %v194_v40 }
  0xee   :  { %198 = vadd.xlane.f32.xlu0 %v197_v43 }
 0x177   :  { %v189_v44 = vpop.xlane.xlu0 %188 }
 0x178   :  { %202 = vst.msk [vmem:[%s345_s3] sm:$0xff] %vm201_vm1, %v189_v44 }
 0x17b   :  { %v199_v45 = vpop.xlane.xlu0 %198 }
 0x17c   :  { %203 = vst.msk [vmem:[%s346_s4] sm:$0xff] %vm201_vm1, %v199_v45 }

// kernel: conv_bn_forward.6
= control target key start
LH: loop header
LB: loop body
LE: loop exit
PB: predicated region body
PF: predicated region fallthrough
CT: control target
= control target key end

     0   :  { %v282_v3 = vmov 0.0|0.0   ;;  %v283_v4 = vmov 0.0   ;;  %vm284_vm0 = vmmov 0   ;;  %vm42_vm1 = vcmask 588800   ;;  %s409_s1 = inlined_call_operand.vmem [shape: f32[72,384], index: 1, kind: input, shape index: {}]   ;;  %s410_s0 = inlined_call_operand.vmem [shape: f32[8,72], index: 0, kind: input, shape index: {}]   ;;  %s411_s2 = inlined_call_operand.vmem [shape: f32[8,384], index: 2, kind: output, shape index: {0}]   ;;  %s412_s3 = inlined_call_operand.vmem [shape: f32[1,8,1], index: 3, kind: output, shape index: {1}]   ;;  %s413_s4 = inlined_call_operand.vmem [shape: f32[1,8,1], index: 4, kind: output, shape index: {2}]  }
   0x1   :  { %v16_v0 = vld [vmem:[%s409_s1 + $0x8] sm:$0xff]  ;;  %v19_v1 = vld [vmem:[%s409_s1 + $0x20] sm:$0xff]  ;;  %267 = vmatprep.subr.bf16.mxu1 %v282_v3  ;;  %110 = vmatprep.mubr.f32.mxu0 %v283_v4  ;;  %v18_v6 = vld [vmem:[%s409_s1 + $0x18] sm:$0xff]  ;;  %vm203_vm2 = vcmask 7168  }
   0x2   :  { %v15_v2 = vld [vmem:[%s409_s1] sm:$0xff]  ;;  %v251_v5 = vpack.c.bf16 %v19_v1, %v16_v0  ;;  %v17_v7 = vld [vmem:[%s409_s1 + $0x10] sm:$0xff]  ;;  %v20_v8 = vld [vmem:[%s409_s1 + $0x28] sm:$0xff]  ;;  %248 = vmatprep.mubr.msk.f32.mxu1 %vm284_vm0, %v283_v4 }
   0x3   :  { %v253_v9 = vpack.c.bf16 %v18_v6, %v15_v2  ;;  %v268_v10 = vpack.c.bf16 %v20_v8, %v17_v7  ;;  %v22_v11 = vld [vmem:[%s409_s1 + $0x38] sm:$0xff]  ;;  %v25_v12 = vld [vmem:[%s409_s1 + $0x50] sm:$0xff]  ;;  %v24_v15 = vld [vmem:[%s409_s1 + $0x48] sm:$0xff] }
   0x4   :  { %v21_v13 = vld [vmem:[%s409_s1 + $0x30] sm:$0xff]  ;;  %252 = vmatprep.subr.bf16.mxu0 %v251_v5  ;;  %v255_v14 = vpack.c.bf16 %v25_v12, %v22_v11  ;;  %v23_v16 = vld [vmem:[%s409_s1 + $0x40] sm:$0xff]  ;;  %v26_v17 = vld [vmem:[%s409_s1 + $0x58] sm:$0xff] }
   0x5   :  { %254 = vmatpush1.bf16.msra.mxu0 %v253_v9  ;;  %269 = vmatpush3.bf16.msra.mxu1 %v268_v10  ;;  %v257_v18 = vpack.c.bf16 %v24_v15, %v21_v13  ;;  %v271_v19 = vpack.c.bf16 %v26_v17, %v23_v16  ;;  %v28_v20 = vld [vmem:[%s409_s1 + $0x68] sm:$0xff]  ;;  %v31_v21 = vld [vmem:[%s409_s1 + $0x80] sm:$0xff]  ;;  %v30_v24 = vld [vmem:[%s409_s1 + $0x78] sm:$0xff] }
   0x6   :  { %v27_v22 = vld [vmem:[%s409_s1 + $0x60] sm:$0xff]  ;;  %256 = vmatprep.subr.bf16.mxu0 %v255_v14  ;;  %270 = vmatprep.subr.bf16.mxu1 %v282_v3  ;;  %v259_v23 = vpack.c.bf16 %v31_v21, %v28_v20  ;;  %v29_v25 = vld [vmem:[%s409_s1 + $0x70] sm:$0xff]  ;;  %v32_v26 = vld [vmem:[%s409_s1 + $0x88] sm:$0xff] }
   0x7   :  { %v34_v27 = vld [vmem:[%s409_s1 + $0x98] sm:$0xff]  ;;  %v37_v28 = vld [vmem:[%s409_s1 + $0xb0] sm:$0xff]  ;;  %v261_v29 = vpack.c.bf16 %v30_v24, %v27_v22  ;;  %v274_v30 = vpack.c.bf16 %v32_v26, %v29_v25  ;;  %v36_v33 = vld [vmem:[%s409_s1 + $0xa8] sm:$0xff] }
   0x8   :  { %v33_v31 = vld [vmem:[%s409_s1 + $0x90] sm:$0xff]  ;;  %v263_v32 = vpack.c.bf16 %v37_v28, %v34_v27  ;;  %v35_v34 = vld [vmem:[%s409_s1 + $0xa0] sm:$0xff]  ;;  %v38_v35 = vld [vmem:[%s409_s1 + $0xb8] sm:$0xff] }
   0x9   :  { %258 = vmatpush1.bf16.msra.mxu0 %v257_v18  ;;  %272 = vmatpush3.bf16.msra.mxu1 %v271_v19  ;;  %v265_v36 = vpack.c.bf16 %v36_v33, %v33_v31  ;;  %v277_v37 = vpack.c.bf16 %v38_v35, %v35_v34  ;;  %v40_v38 = vld [vmem:[%s409_s1 + $0xc8] sm:$0xff]  ;;  %v39_v39 = vld [vmem:[%s409_s1 + $0xc0] sm:$0xff]  ;;  %v41_v40 = vld [vmem:[%s409_s1 + $0xd0] sm:$0xff] }
   0xa   :  { %260 = vmatprep.subr.bf16.mxu0 %v259_v23  ;;  %273 = vmatprep.subr.bf16.mxu1 %v282_v3  ;;  %v14_v41 = vld [vmem:[%s410_s0] sm:$0xff] }
   0xd   :  { %262 = vmatpush1.bf16.msra.mxu0 %v261_v29  ;;  %275 = vmatpush3.bf16.msra.mxu1 %v274_v30 }
   0xe   :  { %264 = vmatprep.subr.bf16.mxu0 %v263_v32  ;;  %276 = vmatprep.subr.bf16.mxu1 %v282_v3 }
  0x11   :  { %266 = vmatpush1.bf16.msra.mxu0 %v265_v36  ;;  %278 = vmatpush3.bf16.msra.mxu1 %v277_v37 }
  0x12   :  { %62 = vmatprep.subr.mxu0 %v40_v38  ;;  %246 = vmatprep.subr.mxu1 %v283_v4 }
  0x15   :  { %63 = vmatpush1.msra.mxu0 %v39_v39  ;;  %247 = vmatpush3.msra.mxu1 %v41_v40 }
  0x16   :  { %218 = vmatmul.mubr.msk.f32.vlgmr.msra.gmra.mrb[0].mxu0 %vm42_vm1, %v14_v41  ;;  %249 = vmatmul.mubr.msk.f32.vlgmr.msra.gmra.mrb[0].mxu1 %vm42_vm1, %v14_v41 }
  0xe9   :  { %v112_v42 = vpop.f32.mrb[0].mxu0  ;;  %v183_v43 = vpop.f32.mrb[0].mxu1 }
  0xea   :  { %187 = vst [vmem:[%s411_s2] sm:$0xff] %v112_v42  ;;  %v195_v44 = vmul.f32 %v112_v42, %v112_v42  ;;  %v114_v45 = vpop.f32.mrb[1].mxu0  ;;  %189 = vst [vmem:[%s411_s2 + $0x10] sm:$0xff] %v183_v43  ;;  %v250_v46 = vpop.f32.mrb[1].mxu1  ;;  %v197_v49 = vmul.f32 %v183_v43, %v183_v43 }
  0xeb   :  { %188 = vst [vmem:[%s411_s2 + $0x8] sm:$0xff] %v114_v45  ;;  %v190_v47 = vadd.f32 %v114_v45, %v112_v42  ;;  %v196_v48 = vmul.f32 %v114_v45, %v114_v45 }
  0xed   :  { %v191_v50 = vadd.f32 %v190_v47, %v183_v43  ;;  %v198_v51 = vadd.f32 %v196_v48, %v195_v44 }
  0xef   :  { %192 = vadd.xlane.f32.xlu0 %v191_v50  ;;  %v199_v52 = vadd.f32 %v198_v51, %v197_v49 }
  0xf3   :  { %200 = vadd.xlane.f32.xlu0 %v199_v52 }
 0x17c   :  { %v193_v53 = vpop.xlane.xlu0 %192 }
 0x17d   :  { %204 = vst.msk [vmem:[%s412_s3] sm:$0xff] %vm203_vm2, %v193_v53 }
 0x180   :  { %v201_v54 = vpop.xlane.xlu0 %200 }
 0x181   :  { %205 = vst.msk [vmem:[%s413_s4] sm:$0xff] %vm203_vm2, %v201_v54 }

// kernel: conv_bn_forward.7
= control target key start
LH: loop header
LB: loop body
LE: loop exit
PB: predicated region body
PF: predicated region fallthrough
CT: control target
= control target key end

     0   :  { %v47_v0 = vmov 0   ;;  %s92_s1 = inlined_call_operand.vmem [shape: f32[8,1], index: 1, kind: input, shape index: {}]   ;;  %s93_s2 = inlined_call_operand.vmem [shape: f32[8,1], index: 2, kind: input, shape index: {}]   ;;  %s94_s0 = inlined_call_operand.vmem [shape: f32[8,384], index: 0, kind: input, shape index: {}]   ;;  %s95_s3 = inlined_call_operand.vmem [shape: f32[8,384], index: 3, kind: output, shape index: {}]  }
   0x1   :  { %46 = vset.pattern.permute.xlu0 %v47_v0  ;;  %v17_v1 = vld [vmem:[%s92_s1] sm:$0xff]  ;;  %v15_v5 = vld [vmem:[%s94_s0 + $0x8] sm:$0xff]  ;;  %v16_v6 = vld [vmem:[%s94_s0 + $0x10] sm:$0xff] }
   0x2   :  { %20 = vperm.xlu0 %46, %v17_v1   ;;  %v26_v2 = vld [vmem:[%s93_s2] sm:$0xff] }
   0x3   :  { %v14_v4 = vld [vmem:[%s94_s0] sm:$0xff] }
   0x6   :  { %29 = vperm.xlu0 %46, %v26_v2  }
  0x81   :  { %v21_v3 = vpop.permute.xlu0 %20 }
  0x82   :  { %v23_v7 = vmul.f32 %v21_v3, %v14_v4  ;;  %v24_v8 = vmul.f32 %v21_v3, %v15_v5  ;;  %v25_v9 = vmul.f32 %v21_v3, %v16_v6 }
  0x85   :  { %v30_v10 = vpop.permute.xlu0 %29 }
  0x86   :  { %v32_v11 = vadd.f32 %v30_v10, %v23_v7  ;;  %v33_v12 = vadd.f32 %v30_v10, %v24_v8  ;;  %v34_v13 = vadd.f32 %v30_v10, %v25_v9 }
  0x88   :  { %v35_v14 = vmax.f32 %v32_v11, 0.0  ;;  %v36_v15 = vmax.f32 %v33_v12, 0.0  ;;  %v37_v16 = vmax.f32 %v34_v13, 0.0 }
  0x8a   :  { %38 = vst [vmem:[%s95_s3] sm:$0xff] %v35_v14  ;;  %39 = vst [vmem:[%s95_s3 + $0x8] sm:$0xff] %v36_v15 }
  0x8b   :  { %40 = vst [vmem:[%s95_s3 + $0x10] sm:$0xff] %v37_v16 }

</bundles_post_ra>
